<compile_context>
chip_gen: v7x
topology: tpu7x:2x2x1
jax: 0.10.0
libtpu: 0.0.40
codegen_flags: <defaults>
</compile_context>

<pallas_src>
import functools
import math

import jax
import jax.numpy as jnp
from jax import lax
from jax.experimental import pallas as pl
from jax.experimental.pallas import tpu as pltpu

BN_EPS = 1e-5
_NUM_CORES = 2     # leading "parallel" grid axis -> both TensorCores on v7x
_STAT_ROWS = 8     # sublane-aligned partial-stat rows per core


def _round_up(x, m):
    return (x + m - 1) // m * m


def _cdiv(a, b):
    return (a + b - 1) // b


# ---------------------------------------------------------------------------
# Pass 1: conv tile (matmul) -> write y once (compact f32) + per-core partial
# per-channel sum / sum-of-squares accumulators (resident across the tile axis).
# ---------------------------------------------------------------------------
def _conv_stats_kernel(cols_ref, w_ref, y_ref, sum_ref, sq_ref):
    @pl.when(pl.program_id(1) == 0)
    def _init():
        sum_ref[...] = jnp.zeros_like(sum_ref)
        sq_ref[...] = jnp.zeros_like(sq_ref)

    # [tile_m, K] (bf16) x [K, outc] (bf16) -> f32 accumulate on the MXU.
    y = jnp.dot(cols_ref[...], w_ref[...], preferred_element_type=jnp.float32)
    y_ref[...] = y

    # Partial-reduce tile_m -> _STAT_ROWS sublane-aligned rows; host folds the
    # remaining _NUM_CORES * _STAT_ROWS rows before the BN affine.
    y3 = y.reshape(y.shape[0] // _STAT_ROWS, _STAT_ROWS, y.shape[1])
    sum_ref[...] += jnp.sum(y3, axis=0)
    sq_ref[...] += jnp.sum(y3 * y3, axis=0)


# ---------------------------------------------------------------------------
# Pass 2: pure elementwise folded-BN affine (y*scale + shift) + ReLU.
# ---------------------------------------------------------------------------
def _bn_relu_kernel(y_ref, scale_ref, shift_ref, out_ref):
    out_ref[...] = jnp.maximum(
        y_ref[...] * scale_ref[...] + shift_ref[...], 0.0
    ).astype(out_ref.dtype)


def _im2col(x, kernel_size, stride, padding):
    # x: [N, C, H, W] -> patches [N*Ho*Wo, C*k*k] (rows: n-major, ho, wo;
    # cols: c-major, kh, kw -- matching weight.reshape(outc, inc*k*k)).
    n, c, h, w = x.shape
    k = kernel_size
    xp = jnp.pad(x, ((0, 0), (0, 0), (padding, padding), (padding, padding)))
    ho = (h + 2 * padding - k) // stride + 1
    wo = (w + 2 * padding - k) // stride + 1
    taps = []
    for i in range(k):
        for j in range(k):
            taps.append(xp[:, :, i:i + stride * ho:stride, j:j + stride * wo:stride])
    cols = jnp.stack(taps, axis=2)                       # [N, C, k*k, Ho, Wo]
    cols = cols.transpose(0, 3, 4, 1, 2).reshape(n * ho * wo, c * k * k)
    return cols, ho, wo


def down_conv_layer(x, weight, gamma, beta, *, stride=2, padding=1,
                    tile_m=4096, mxu_dtype=jnp.bfloat16, out_format="NCHW"):
    """Forward pass of DownConvLayer (training-mode BatchNorm).

    x:      [N, inc, H, W]  float32 (NCHW, matching PyTorch)
    weight: [outc, inc, 3, 3]
    gamma, beta: [outc]
    returns [N, outc, Ho, Wo] float32 (or NHWC if out_format == "NHWC")
    """
    n, inc, h, w = x.shape
    outc, _, kh, kw = weight.shape
    assert kh == kw == 3

    cols, ho, wo = _im2col(x, kh, stride, padding)        # [M, K] f32
    m_true, k = cols.shape

    # Tile over M across _NUM_CORES cores; padded rows are zero (contribute
    # nothing to the stats) and are sliced off at the end.  tile_m kept a
    # multiple of 16 for bf16 sublane packing.
    tile_m = _round_up(
        max(16, min(tile_m, _round_up(_cdiv(m_true, _NUM_CORES), 16))), 16)
    nm_per_core = _cdiv(m_true, _NUM_CORES * tile_m)
    nm_total = _NUM_CORES * nm_per_core
    m_pad = nm_total * tile_m
    if m_pad != m_true:
        cols = jnp.pad(cols, ((0, m_pad - m_true), (0, 0)))
    cols = cols.astype(mxu_dtype)

    w2d = weight.reshape(outc, inc * kh * kw).T.astype(mxu_dtype)   # [K, outc]

    # ---- pass 1: conv output written once + per-core partial stats ----------
    y_flat, sums, sqs = pl.pallas_call(
        _conv_stats_kernel,
        out_shape=(
            jax.ShapeDtypeStruct((m_pad, outc), jnp.float32),
            jax.ShapeDtypeStruct((_NUM_CORES * _STAT_ROWS, outc), jnp.float32),
            jax.ShapeDtypeStruct((_NUM_CORES * _STAT_ROWS, outc), jnp.float32),
        ),
        grid=(_NUM_CORES, nm_per_core),
        in_specs=[
            pl.BlockSpec((tile_m, k), lambda c, i: (c * nm_per_core + i, 0)),
            pl.BlockSpec((k, outc), lambda c, i: (0, 0)),
        ],
        out_specs=(
            pl.BlockSpec((tile_m, outc), lambda c, i: (c * nm_per_core + i, 0)),
            pl.BlockSpec((_STAT_ROWS, outc), lambda c, i: (c, 0)),
            pl.BlockSpec((_STAT_ROWS, outc), lambda c, i: (c, 0)),
        ),
        compiler_params=pltpu.CompilerParams(
            dimension_semantics=("parallel", "arbitrary")),
    )(cols, w2d)

    # ---- fold BN into a per-channel affine (tiny host-side op) --------------
    m_f = jnp.float32(m_true)
    sum_c = jnp.sum(sums, axis=0)
    sq_c = jnp.sum(sqs, axis=0)
    mean = sum_c / m_f
    var = jnp.maximum(sq_c / m_f - mean * mean, 0.0)      # biased variance
    inv_std = lax.rsqrt(var + BN_EPS)
    g = gamma.astype(jnp.float32)
    b = beta.astype(jnp.float32)
    scale = (g * inv_std).reshape(1, outc)
    shift = (b - mean * g * inv_std).reshape(1, outc)

    # ---- pass 2: elementwise normalize + ReLU over y (compact blocks) -------
    out_flat = pl.pallas_call(
        _bn_relu_kernel,
        out_shape=jax.ShapeDtypeStruct((m_pad, outc), jnp.float32),
        grid=(nm_total,),
        in_specs=[
            pl.BlockSpec((tile_m, outc), lambda i: (i, 0)),
            pl.BlockSpec((1, outc), lambda i: (0, 0)),
            pl.BlockSpec((1, outc), lambda i: (0, 0)),
        ],
        out_specs=pl.BlockSpec((tile_m, outc), lambda i: (i, 0)),
        compiler_params=pltpu.CompilerParams(
            dimension_semantics=("parallel",)),
    )(y_flat, scale, shift)

    out = out_flat[:m_true].reshape(n, ho, wo, outc)      # NHWC
    if out_format == "NHWC":
        return out
    return out.transpose(0, 3, 1, 2)                      # PyTorch NCHW parity


def _reference(x, weight, gamma, beta, *, stride=2, padding=1,
               conv_dtype=jnp.float32):
    # Pure-JAX reference: conv (NCHW) + training-mode BN + ReLU.
    y = lax.conv_general_dilated(
        x.astype(conv_dtype), weight.astype(conv_dtype),
        window_strides=(stride, stride),
        padding=((padding, padding), (padding, padding)),
        dimension_numbers=("NCHW", "OIHW", "NCHW"),
        preferred_element_type=jnp.float32)
    mean = jnp.mean(y, axis=(0, 2, 3), keepdims=True)
    var = jnp.mean((y - mean) ** 2, axis=(0, 2, 3), keepdims=True)
    y_hat = (y - mean) * lax.rsqrt(var + BN_EPS)
    y_hat = y_hat * gamma.reshape(1, -1, 1, 1) + beta.reshape(1, -1, 1, 1)
    return jnp.maximum(y_hat, 0.0)


if __name__ == "__main__":
    # Small shapes consistent with the module: N=2, inc=4, outc=8, H=W=16.
    N, INC, OUTC, H, W = 2, 4, 8, 16, 16
    STRIDE, PAD, K = 2, 1, 3

    key = jax.random.PRNGKey(0)
    kx, kwt = jax.random.split(key)
    x = jax.random.normal(kx, (N, INC, H, W), dtype=jnp.float32)

    # Conv2d has no bias; BN default affine params: gamma=1, beta=0.
    fan_in = INC * K * K
    bound = 1.0 / math.sqrt(fan_in)
    weight = jax.random.uniform(kwt, (OUTC, INC, K, K),
                                minval=-bound, maxval=bound, dtype=jnp.float32)
    gamma = jnp.ones((OUTC,), dtype=jnp.float32)
    beta = jnp.zeros((OUTC,), dtype=jnp.float32)

    # tile_m=32 -> per-core grid of 2 tiles (M = 2*8*8 = 128, 2 "cores") so the
    # cross-tile stat-accumulation path is exercised even at this toy shape.
    fwd = jax.jit(functools.partial(down_conv_layer, stride=STRIDE, padding=PAD,
                                    tile_m=32))
    out = jax.block_until_ready(fwd(x, weight, gamma, beta))

    assert out.shape == (N, OUTC, H // STRIDE, W // STRIDE), out.shape

    # Precision-matched reference (bf16 MXU operands, f32 accumulate): tight.
    ref_bf16 = _reference(x, weight, gamma, beta, stride=STRIDE, padding=PAD,
                          conv_dtype=jnp.bfloat16)
    err = float(jnp.max(jnp.abs(out - ref_bf16)))
    assert err < 2e-3, err

    # Full-f32 reference: loose bound covering bf16 operand quantization.
    ref_f32 = _reference(x, weight, gamma, beta, stride=STRIDE, padding=PAD,
                         conv_dtype=jnp.float32)
    err32 = float(jnp.max(jnp.abs(out - ref_f32)))
    assert err32 < 5e-2, err32

    print("KERNEL_OK")
</pallas_src>

<mosaic_0001>
module attributes {stable_mosaic.version = 11 : i64} {
  func.func @_conv_stats_kernel(%arg0: i32, %arg1: i32, %arg2: memref<32x36xbf16, #tpu.memory_space<vmem>>, %arg3: memref<36x8xbf16, #tpu.memory_space<vmem>>, %arg4: memref<32x8xf32, #tpu.memory_space<vmem>>, %arg5: memref<8x8xf32, #tpu.memory_space<vmem>>, %arg6: memref<8x8xf32, #tpu.memory_space<vmem>>) attributes {dimension_semantics = [#tpu.dimension_semantics<parallel>, #tpu.dimension_semantics<arbitrary>], iteration_bounds = array<i64: 2, 2>, scalar_prefetch = 0 : i64, scratch_operands = 0 : i64, tpu.core_type = #tpu.core_type<tc>, window_params = [{transform_indices = @transform_0, window_bounds = array<i64: 32, 36>}, {pipeline_mode = #tpu.pipeline_mode<synchronous>, transform_indices = @transform_1, window_bounds = array<i64: 36, 8>}, {transform_indices = @transform_2, window_bounds = array<i64: 32, 8>}, {transform_indices = @transform_3, window_bounds = array<i64: 8, 8>}, {transform_indices = @transform_4, window_bounds = array<i64: 8, 8>}]} {
    %c0_i32 = arith.constant 0 : i32
    %0 = arith.cmpi eq, %arg1, %c0_i32 : i32
    %1 = arith.extui %0 : i1 to i32
    %c0_i32_0 = arith.constant 0 : i32
    %2 = arith.cmpi ne, %1, %c0_i32_0 : i32
    scf.if %2 {
      %cst_16 = arith.constant 0.000000e+00 : f32
      %17 = vector.broadcast %cst_16 : f32 to vector<8x8xf32>
      %c0_17 = arith.constant 0 : index
      %c0_18 = arith.constant 0 : index
      %18 = vector.load %arg5[%c0_17, %c0_18] : memref<8x8xf32, #tpu.memory_space<vmem>>, vector<8x8xf32>
      tpu.vector_store %arg5[%c0_17, %c0_18], %17 {strides = array<i32>} : memref<8x8xf32, #tpu.memory_space<vmem>>, vector<8x8xf32>,
      %cst_19 = arith.constant 0.000000e+00 : f32
      %19 = vector.broadcast %cst_19 : f32 to vector<8x8xf32>
      %c0_20 = arith.constant 0 : index
      %c0_21 = arith.constant 0 : index
      %20 = vector.load %arg6[%c0_20, %c0_21] : memref<8x8xf32, #tpu.memory_space<vmem>>, vector<8x8xf32>
      tpu.vector_store %arg6[%c0_20, %c0_21], %19 {strides = array<i32>} : memref<8x8xf32, #tpu.memory_space<vmem>>, vector<8x8xf32>,
    } else {
    }
    %c0 = arith.constant 0 : index
    %c0_1 = arith.constant 0 : index
    %3 = vector.load %arg2[%c0, %c0_1] : memref<32x36xbf16, #tpu.memory_space<vmem>>, vector<32x36xbf16>
    %c0_2 = arith.constant 0 : index
    %c0_3 = arith.constant 0 : index
    %4 = vector.load %arg3[%c0_2, %c0_3] : memref<36x8xbf16, #tpu.memory_space<vmem>>, vector<36x8xbf16>
    %cst = arith.constant dense<0.000000e+00> : vector<32x8xf32>
    %5 = tpu.matmul %3, %4, %cst {dimension_numbers = #tpu.dot_dimension_numbers<[1], [0], [0], [1], [0, 0, 1, 1], [], []>} : vector<32x36xbf16>, vector<36x8xbf16>, vector<32x8xf32> -> vector<32x8xf32>
    %c0_4 = arith.constant 0 : index
    %c0_5 = arith.constant 0 : index
    %6 = vector.load %arg4[%c0_4, %c0_5] : memref<32x8xf32, #tpu.memory_space<vmem>>, vector<32x8xf32>
    tpu.vector_store %arg4[%c0_4, %c0_5], %5 {strides = array<i32>} : memref<32x8xf32, #tpu.memory_space<vmem>>, vector<32x8xf32>,
    %7 = vector.shape_cast %5 : vector<32x8xf32> to vector<4x8x8xf32>
    %c0_6 = arith.constant 0 : index
    %c0_7 = arith.constant 0 : index
    %8 = vector.load %arg5[%c0_6, %c0_7] : memref<8x8xf32, #tpu.memory_space<vmem>>, vector<8x8xf32>
    %cst_8 = arith.constant dense<0.000000e+00> : vector<8x8xf32>
    %9 = vector.multi_reduction <add>, %7, %cst_8 [0] : vector<4x8x8xf32> to vector<8x8xf32>
    %10 = arith.addf %8, %9 : vector<8x8xf32>
    %c0_9 = arith.constant 0 : index
    %c0_10 = arith.constant 0 : index
    %11 = vector.load %arg5[%c0_9, %c0_10] : memref<8x8xf32, #tpu.memory_space<vmem>>, vector<8x8xf32>
    tpu.vector_store %arg5[%c0_9, %c0_10], %10 {strides = array<i32>} : memref<8x8xf32, #tpu.memory_space<vmem>>, vector<8x8xf32>,
    %c0_11 = arith.constant 0 : index
    %c0_12 = arith.constant 0 : index
    %12 = vector.load %arg6[%c0_11, %c0_12] : memref<8x8xf32, #tpu.memory_space<vmem>>, vector<8x8xf32>
    %13 = arith.mulf %7, %7 : vector<4x8x8xf32>
    %cst_13 = arith.constant dense<0.000000e+00> : vector<8x8xf32>
    %14 = vector.multi_reduction <add>, %13, %cst_13 [0] : vector<4x8x8xf32> to vector<8x8xf32>
    %15 = arith.addf %12, %14 : vector<8x8xf32>
    %c0_14 = arith.constant 0 : index
    %c0_15 = arith.constant 0 : index
    %16 = vector.load %arg6[%c0_14, %c0_15] : memref<8x8xf32, #tpu.memory_space<vmem>>, vector<8x8xf32>
    tpu.vector_store %arg6[%c0_14, %c0_15], %15 {strides = array<i32>} : memref<8x8xf32, #tpu.memory_space<vmem>>, vector<8x8xf32>,
    return
  }
  func.func @transform_0(%arg0: i32, %arg1: i32) -> (i32, i32) {
    %c2_i32 = arith.constant 2 : i32
    %0 = arith.muli %arg0, %c2_i32 : i32
    %1 = arith.addi %0, %arg1 : i32
    %c0_i32 = arith.constant 0 : i32
    %c0_i32_0 = arith.constant 0 : i32
    return %1, %c0_i32 : i32, i32
  }
  func.func @transform_1(%arg0: i32, %arg1: i32) -> (i32, i32) {
    %c0_i32 = arith.constant 0 : i32
    %c0_i32_0 = arith.constant 0 : i32
    %c0_i32_1 = arith.constant 0 : i32
    return %c0_i32, %c0_i32_0 : i32, i32
  }
  func.func @transform_2(%arg0: i32, %arg1: i32) -> (i32, i32) {
    %c2_i32 = arith.constant 2 : i32
    %0 = arith.muli %arg0, %c2_i32 : i32
    %1 = arith.addi %0, %arg1 : i32
    %c0_i32 = arith.constant 0 : i32
    %c0_i32_0 = arith.constant 0 : i32
    return %1, %c0_i32 : i32, i32
  }
  func.func @transform_3(%arg0: i32, %arg1: i32) -> (i32, i32) {
    %c0_i32 = arith.constant 0 : i32
    %c0_i32_0 = arith.constant 0 : i32
    return %arg0, %c0_i32 : i32, i32
  }
  func.func @transform_4(%arg0: i32, %arg1: i32) -> (i32, i32) {
    %c0_i32 = arith.constant 0 : i32
    %c0_i32_0 = arith.constant 0 : i32
    return %arg0, %c0_i32 : i32, i32
  }
}

module attributes {stable_mosaic.version = 11 : i64} {
  func.func @_bn_relu_kernel(%arg0: i32, %arg1: memref<32x8xf32, #tpu.memory_space<vmem>>, %arg2: memref<1x8xf32, #tpu.memory_space<vmem>>, %arg3: memref<1x8xf32, #tpu.memory_space<vmem>>, %arg4: memref<32x8xf32, #tpu.memory_space<vmem>>) attributes {dimension_semantics = [#tpu.dimension_semantics<parallel>], iteration_bounds = array<i64: 4>, scalar_prefetch = 0 : i64, scratch_operands = 0 : i64, tpu.core_type = #tpu.core_type<tc>, window_params = [{transform_indices = @transform_0, window_bounds = array<i64: 32, 8>}, {pipeline_mode = #tpu.pipeline_mode<synchronous>, transform_indices = @transform_1, window_bounds = array<i64: 1, 8>}, {pipeline_mode = #tpu.pipeline_mode<synchronous>, transform_indices = @transform_2, window_bounds = array<i64: 1, 8>}, {transform_indices = @transform_3, window_bounds = array<i64: 32, 8>}]} {
    %c0 = arith.constant 0 : index
    %c0_0 = arith.constant 0 : index
    %0 = vector.load %arg1[%c0, %c0_0] : memref<32x8xf32, #tpu.memory_space<vmem>>, vector<32x8xf32>
    %c0_1 = arith.constant 0 : index
    %c0_2 = arith.constant 0 : index
    %1 = vector.load %arg2[%c0_1, %c0_2] : memref<1x8xf32, #tpu.memory_space<vmem>>, vector<1x8xf32>
    %2 = vector.broadcast %1 : vector<1x8xf32> to vector<32x8xf32>
    %3 = arith.mulf %0, %2 : vector<32x8xf32>
    %c0_3 = arith.constant 0 : index
    %c0_4 = arith.constant 0 : index
    %4 = vector.load %arg3[%c0_3, %c0_4] : memref<1x8xf32, #tpu.memory_space<vmem>>, vector<1x8xf32>
    %5 = vector.broadcast %4 : vector<1x8xf32> to vector<32x8xf32>
    %6 = arith.addf %3, %5 : vector<32x8xf32>
    %cst = arith.constant 0.000000e+00 : f32
    %7 = vector.broadcast %cst : f32 to vector<32x8xf32>
    %8 = arith.maximumf %6, %7 : vector<32x8xf32>
    %c0_5 = arith.constant 0 : index
    %c0_6 = arith.constant 0 : index
    %9 = vector.load %arg4[%c0_5, %c0_6] : memref<32x8xf32, #tpu.memory_space<vmem>>, vector<32x8xf32>
    tpu.vector_store %arg4[%c0_5, %c0_6], %8 {strides = array<i32>} : memref<32x8xf32, #tpu.memory_space<vmem>>, vector<32x8xf32>,
    return
  }
  func.func @transform_0(%arg0: i32) -> (i32, i32) {
    %c0_i32 = arith.constant 0 : i32
    %c0_i32_0 = arith.constant 0 : i32
    return %arg0, %c0_i32 : i32, i32
  }
  func.func @transform_1(%arg0: i32) -> (i32, i32) {
    %c0_i32 = arith.constant 0 : i32
    %c0_i32_0 = arith.constant 0 : i32
    %c0_i32_1 = arith.constant 0 : i32
    return %c0_i32, %c0_i32_0 : i32, i32
  }
  func.func @transform_2(%arg0: i32) -> (i32, i32) {
    %c0_i32 = arith.constant 0 : i32
    %c0_i32_0 = arith.constant 0 : i32
    %c0_i32_1 = arith.constant 0 : i32
    return %c0_i32, %c0_i32_0 : i32, i32
  }
  func.func @transform_3(%arg0: i32) -> (i32, i32) {
    %c0_i32 = arith.constant 0 : i32
    %c0_i32_0 = arith.constant 0 : i32
    return %arg0, %c0_i32 : i32, i32
  }
}

</mosaic_0001>

<bundles_post_ra>
// kernel: down_conv_layer.3
= control target key start
LH: loop header
LB: loop body
LE: loop exit
PB: predicated region body
PF: predicated region fallthrough
CT: control target
= control target key end

     0   :  { %s314_s12 = smov 0   ;;  %s337_s0 = inlined_call_operand.vmem [shape: f32[128,8], index: 0, kind: input, shape index: {}]   ;;  %s338_s1 = inlined_call_operand.vmem [shape: f32[1,8], index: 1, kind: input, shape index: {}]   ;;  %s339_s2 = inlined_call_operand.vmem [shape: f32[1,8], index: 2, kind: input, shape index: {}]   ;;  %s340_s3 = inlined_call_operand.vmem [shape: f32[128,8], index: 3, kind: output, shape index: {}]  }
   0x1 LB: > { %s265_s13 = sadd.s32 4294967295, %s292_s12   ;;  %p269_p0 = scmp.ge.s32.totalorder %s292_s12, 1  ;;  %s292_s12 = sphi %s314_s12, %s13_s12  }
   0x2   : > { %p138_p1 = scmp.lt.s32.totalorder %s292_s12, 5 }
   0x4   : > { %p139_p2 = pnand %p269_p0, %p138_p1 }
   0x5   : > { %s270_s14 = sshll.u32 (!%p139_p2), %s265_s13, 2  ;;  %v274_v0 = vld [vmem:[%s338_s1] ss:$0 sm:$0xff] (!%p139_p2)  ;;  %vm204_vm0 = vcmask (!%p139_p2), 64512  }
   0x6   : > { %142 = sbr.rel (%p139_p2) target bundleno = 25 (0x19), region = 32  ;;  %p163_p3 = scmp.lt.s32.totalorder (!%p139_p2), %s270_s14, 15  ;;  %v275_v1 = vld [vmem:[%s339_s2] ss:$0 sm:$0xff] (!%p139_p2) }
   0xd   : > { %s342_s14 = smov (!%p163_p3, %s270_s14), 15 }
   0xe   : > { %s271_s15 = sshll.u32 %s342_s14, 3 }
   0xf   : > { %s166_s20 = scalar_lea.vmem %s337_s0, %s271_s15  ;;  %s172_s25 = scalar_lea.vmem %s340_s3, %s271_s15 }
  0x10   : > { %v174_v2 = vld [vmem:[%s166_s20] sm:$0xff]  ;;  %v175_v3 = vld [vmem:[%s166_s20 + $0x8] sm:$0xff]  ;;  %v176_v4 = vld [vmem:[%s166_s20 + $0x10] sm:$0xff] }
  0x11   : > { %v185_v5 = vmul.f32 %v274_v0, %v174_v2  ;;  %v186_v6 = vmul.f32 %v274_v0, %v175_v3  ;;  %v187_v7 = vmul.f32 %v274_v0, %v176_v4  ;;  %v177_v8 = vld [vmem:[%s166_s20 + $0x18] sm:$0xff] }
  0x12   : > { %v188_v9 = vmul.f32 %v274_v0, %v177_v8 }
  0x13   : > { %v196_v10 = vadd.f32 %v275_v1, %v185_v5  ;;  %v197_v11 = vadd.f32 %v275_v1, %v186_v6  ;;  %v198_v12 = vadd.f32 %v275_v1, %v187_v7 }
  0x14   : > { %v199_v13 = vadd.f32 %v275_v1, %v188_v9 }
  0x15   : > { %v200_v14 = vmax.f32 %v196_v10, 0.0  ;;  %v201_v15 = vmax.f32 %v197_v11, 0.0  ;;  %v202_v16 = vmax.f32 %v198_v12, 0.0 }
  0x16   : > { %v203_v17 = vmax.f32 %v199_v13, 0.0 }
  0x17   : > { %205 = vst.msk [vmem:[%s172_s25] sm:$0xff] %vm204_vm0, %v200_v14  ;;  %206 = vst.msk [vmem:[%s172_s25 + $0x8] sm:$0xff] %vm204_vm0, %v201_v15 }
  0x18   : > { %207 = vst.msk [vmem:[%s172_s25 + $0x10] sm:$0xff] %vm204_vm0, %v202_v16  ;;  %208 = vst.msk [vmem:[%s172_s25 + $0x18] sm:$0xff] %vm204_vm0, %v203_v17 }
  0x19 PF: > { %s13_s12 = sadd.s32 1, %s292_s12  }
  0x1a   : > { %p10_p4 = scmp.ge.s32.totalorder %s13_s12, 6  }
  0x1c   :  { %12 = sbr.rel (!%p10_p4) target bundleno = 1 (0x1), region = 62 }

// kernel: down_conv_layer.2
= control target key start
LH: loop header
LB: loop body
LE: loop exit
PB: predicated region body
PF: predicated region fallthrough
CT: control target
= control target key end

     0   :  { %s680_s15 = smov 0   ;;  %s682_s16 = smov 0   ;;  %s780_s0 = inlined_call_operand.vmem [shape: bf16[128,36], index: 0, kind: input, shape index: {}]   ;;  %s781_s1 = inlined_call_operand.vmem [shape: bf16[36,8], index: 1, kind: input, shape index: {}]   ;;  %s782_s2 = inlined_call_operand.vmem [shape: f32[128,8], index: 2, kind: output, shape index: {0}]   ;;  %s783_s3 = inlined_call_operand.vmem [shape: f32[16,8], index: 3, kind: output, shape index: {1}]   ;;  %s784_s4 = inlined_call_operand.vmem [shape: f32[16,8], index: 4, kind: output, shape index: {2}]  }
   0x1   :  { %s684_s17 = smov 0   ;;  %s686_s18 = smov 0  }
   0x2   :  { %s688_s19 = smov 0  }
   0x3 LB: > { %s24_s20 = sadd.s32 1, %s644_s17  ;;  %s27_s21 = sadd.s32 1, %s648_s18  ;;  %s652_s19 = sphi %s688_s19, %s15_s19   ;;  %s648_s18 = sphi %s686_s18, %s788_s18   ;;  %s644_s17 = sphi %s684_s17, %s787_s17   ;;  %s640_s16 = sphi %s682_s16, %s786_s16   ;;  %s636_s15 = sphi %s680_s15, %s785_s15  }
   0x4   : > { %p25_p0 = scmp.ge.s32.totalorder %s24_s20, 2  ;;  %p533_p1 = scmp.ge.s32.totalorder %s652_s19, 1 }
   0x5   : > { %p192_p2 = scmp.lt.s32.totalorder %s652_s19, 5 }
   0x6   : > { %s790_s20 = smov (%p25_p0, %s24_s20), 0  ;;  %s792_s21 = smov (!%p25_p0, %s27_s21), %s648_s18 }
   0x7   : > { %p193_p3 = pnand %p533_p1, %p192_p2  ;;  %p29_p4 = scmp.ge.s32.totalorder %s792_s21, 2 }
   0x8   : > { %s534_s22 = sshll.u32 (!%p193_p3), %s640_s16, 1  ;;  %p250_p5 = scmp.lt.s32.totalorder (!%p193_p3), %s640_s16, 1 }
   0x9   : > { %s794_s21 = smov (%p29_p4, %s792_s21), 0  ;;  %196 = sbr.rel (%p193_p3) target bundleno = 267 (0x10b), region = 28 }
   0xa   : > { %s231_s23 = sadd.s32 (!%p193_p3), %s636_s15, %s534_s22  ;;  %p542_p7 = scmp.ne.s32.totalorder (!%p193_p3), %s636_s15, 0 }
   0xb   : > { %s535_s24 = sshll.u32 (!%p193_p3), %s231_s23, 2 }
   0xc   : > { %p233_p6 = scmp.lt.s32.totalorder (!%p193_p3), %s535_s24, 15 }
  0x10   : > { %s796_s16 = smov (!%p250_p5, %s640_s16), 1  ;;  %s798_s24 = smov (!%p233_p6, %s535_s24), 15 }
  0x11   : > { %s540_s25 = sshll.u32 %s796_s16, 3  ;;  %s536_s26 = sshll.u32 %s798_s24, 2  ;;  %vm263_vm0 = vcmask (!%p542_p7), 64512   ;;  %v654_v0 = vmov (!%p542_p7), 0.0  }
  0x12   : > { %s539_s27 = sshll.u32 %s798_s24, 3  ;;  %s236_s30 = scalar_lea.vmem %s780_s0, %s536_s26 }
  0x13   : > { %s719_s7 = scalar_lea.vmem %s782_s2, %s539_s27  ;;  %s724_s10 = scalar_lea.vmem %s783_s3, %s540_s25 }
  0x14   : > { %s729_s13 = scalar_lea.vmem %s784_s4, %s540_s25  ;;  %262 = sbr.rel (%p542_p7) target bundleno = 27 (0x1b), region = 32  ;;  %264 = vst.msk [vmem:[%s724_s10] sm:$0xff] (!%p542_p7), %vm263_vm0, %v654_v0 }
  0x15   : > { %265 = vst.msk [vmem:[%s729_s13] sm:$0xff] (!%p542_p7), %vm263_vm0, %v654_v0 }
  0x1b PF: > { %v609_v1 = vld [vmem:[%s781_s1] sm:$0xff]   ;;  %v610_v2 = vld [vmem:[%s781_s1 + $0x8] sm:$0xff]   ;;  %vm300_vm1 = vcmask 293888   ;;  %v611_v4 = vld [vmem:[%s781_s1 + $0x10] ss:$0 sps:$4 sm:$0x33]  }
  0x1c   : > { %557 = vmatprep.subr.bf16.mxu0 %v609_v1  ;;  %v612_v3 = vld [vmem:[%s236_s30] sm:$0xff]   ;;  %vm307_vm2 = vcmask 1041408   ;;  %v613_v6 = vld [vmem:[%s236_s30 + $0x8] sm:$0xff]   ;;  %vm360_vm3 = vcmask 64512  }
  0x1d   : > { %558 = vmatpush3.bf16.msra.mxu0 %v609_v1  ;;  %563 = vmatprep.mubr.msk.bf16.mxu0 %vm300_vm1, %v612_v3  ;;  %v309_v5 = vsel %vm307_vm2, %v611_v4, 0  ;;  %v365_v25 = vld [vmem:[%s724_s10] sm:$0xff] }
  0x1e   : > { %559 = vmatprep.subr.bf16.mxu0 %v610_v2  ;;  %v375_v29 = vld [vmem:[%s729_s13] sm:$0xff] }
  0x21   : > { %560 = vmatpush3.bf16.msra.mxu0 %v610_v2 }
  0x22   : > { %567 = vmatprep.subr.msk.bf16.mxu0 %vm307_vm2, %v611_v4 }
  0x25   : > { %562 = vmatpush3.bf16.msra.mxu0 %v309_v5 }
  0x28   : > { %564 = vmatmul.mubr.msk.bf16.vlgmr.msra.gmra.mrb[0].mxu0 %vm300_vm1, %v613_v6 }
  0xfb   : > { %v565_v7 = vpop.f32.mrb[0].mxu0 }
  0xfc   : > { %363 = vst.msk [vmem:[%s719_s7 + $0x10] sm:$0xff] %vm360_vm3, %v565_v7  ;;  %v345_v8 = vpop.f32.mrb[1].mxu0  ;;  %v378_v12 = vmul.f32 %v565_v7, %v565_v7  ;;  %v369_v17 = vsel %vm360_vm3, %v565_v7, 0.0 }
  0xfd   : > { %361 = vst.msk [vmem:[%s719_s7] sm:$0xff] %vm360_vm3, %v345_v8  ;;  %v376_v9 = vmul.f32 %v345_v8, %v345_v8  ;;  %v566_v10 = vpop.f32.mrb[2].mxu0  ;;  %v366_v13 = vsel %vm360_vm3, %v345_v8, 0.0 }
  0xfe   : > { %364 = vst.msk [vmem:[%s719_s7 + $0x18] sm:$0xff] %vm360_vm3, %v566_v10  ;;  %v348_v11 = vpop.f32.mrb[3].mxu0  ;;  %v379_v19 = vmul.f32 %v566_v10, %v566_v10  ;;  %v383_v23 = vsel %vm360_vm3, %v378_v12, 0.0  ;;  %v371_v24 = vsel %vm360_vm3, %v566_v10, 0.0 }
  0xff   : > { %362 = vst.msk [vmem:[%s719_s7 + $0x8] sm:$0xff] %vm360_vm3, %v348_v11  ;;  %v367_v14 = vsel %vm360_vm3, %v348_v11, 0.0  ;;  %v377_v15 = vmul.f32 %v348_v11, %v348_v11  ;;  %v380_v18 = vsel %vm360_vm3, %v376_v9, 0.0 }
 0x100   : > { %v368_v16 = vadd.f32 %v367_v14, %v366_v13  ;;  %v385_v28 = vsel %vm360_vm3, %v379_v19, 0.0 }
 0x101   : > { %v381_v20 = vsel %vm360_vm3, %v377_v15, 0.0 }
 0x102   : > { %v370_v21 = vadd.f32 %v369_v17, %v368_v16  ;;  %v382_v22 = vadd.f32 %v381_v20, %v380_v18 }
 0x104   : > { %v372_v26 = vadd.f32 %v371_v24, %v370_v21  ;;  %v384_v27 = vadd.f32 %v383_v23, %v382_v22 }
 0x106   : > { %v373_v30 = vadd.f32 %v372_v26, %v365_v25  ;;  %v386_v31 = vadd.f32 %v385_v28, %v384_v27 }
 0x108   : > { %374 = vst.msk [vmem:[%s724_s10] sm:$0xff] %vm360_vm3, %v373_v30  ;;  %v387_v32 = vadd.f32 %v386_v31, %v375_v29 }
 0x10a   : > { %388 = vst.msk [vmem:[%s729_s13] sm:$0xff] %vm360_vm3, %v387_v32 }
 0x10b PF: > { %s15_s19 = sadd.s32 1, %s652_s19   ;;  %s785_s15 = smov %s644_s17 }
 0x10c   : > { %p12_p8 = scmp.ge.s32.totalorder %s15_s19, 6   ;;  %s786_s16 = smov %s648_s18 }
 0x10d   : > { %s787_s17 = smov %s790_s20  ;;  %s788_s18 = smov %s794_s21 }
 0x10e   :  { %14 = sbr.rel (!%p12_p8) target bundleno = 3 (0x3), region = 86 }

</bundles_post_ra>
